<compile_context>
chip_gen: v7x
topology: tpu7x:2x2x1
jax: 0.10.0
libtpu: 0.0.40
codegen_flags: <defaults>
</compile_context>

<pallas_src>
import math

import jax
import jax.numpy as jnp
from jax.experimental import pallas as pl
from jax.experimental.pallas import tpu as pltpu

_BLOCK_BUDGET_BYTES = 4 * 1024 * 1024   # per output block (pipeliner double-buffers it)
_VMEM_LIMIT_BYTES = 32 * 1024 * 1024    # explicit scoped-VMEM limit, safe on v5e/v6e/v7x


def _constant_input_kernel(const_ref, o_ref):
    # const_ref: (1, ct)  -- same block index every step (no re-DMA by the pipeliner)
    # o_ref:     (bt, ct) -- one batch x feature tile of the flattened output
    o_ref[...] = jnp.broadcast_to(const_ref[...], o_ref.shape)


def _sublane(itemsize: int) -> int:
    # Rows per vreg for this dtype: f32 -> 8, bf16 -> 16, int8/fp8 -> 32.
    return 8 * max(1, 4 // max(1, itemsize))


def _choose_cols(cols_total: int, itemsize: int, sublane: int) -> int:
    """Feature-axis block width (multiple of 128 lanes when possible)."""
    if cols_total % 128 != 0:
        # Tiny / odd feature dims: keep full width; stores are masked but small.
        return cols_total
    max_cols = _BLOCK_BUDGET_BYTES // max(1, sublane * itemsize)
    max_cols = max(128, (max_cols // 128) * 128)
    return cols_total if max_cols >= cols_total else max_cols


def _choose_rows(rows_total: int, cols_block: int, itemsize: int, sublane: int) -> int:
    """Batch-axis block height, sublane-aligned, targeting >=2 (~4) grid steps."""
    if rows_total <= sublane:
        return rows_total  # single full-height block (equals the full array dim)
    max_rows = _BLOCK_BUDGET_BYTES // max(1, cols_block * itemsize)
    max_rows = max(sublane, (max_rows // sublane) * sublane)
    # Aim for ~4 grid steps so writeback of block i-1 overlaps fill of block i
    # and v7x's two TensorCores both get work.
    desired = -(-rows_total // 4)
    desired = max(sublane, ((desired + sublane - 1) // sublane) * sublane)
    return min(max_rows, desired, rows_total)


def constant_input_forward(const_param: jax.Array, batch: int) -> jax.Array:
    """Replicates `const_param` (1, C, H, W) across the batch dimension.

    Equivalent to PyTorch `self.input.repeat(batch, 1, 1, 1)`.
    """
    _, C, H, W = const_param.shape
    feat = C * H * W
    dtype = const_param.dtype
    itemsize = jnp.dtype(dtype).itemsize
    sublane = _sublane(itemsize)

    # Flatten so the output's last dim is the lane axis.
    const_flat = const_param.reshape(1, feat)

    # Lane-density: if feat is not a multiple of 128, fold g batch rows into the
    # lane axis (constant tiled g times) so stores are unmasked full-width vst.
    rows_total, cols_total = batch, feat
    if feat % 128 != 0:
        g = math.lcm(feat, 128) // feat
        if g <= batch and batch % g == 0:
            const_flat = jnp.tile(const_flat, (1, g))
            rows_total, cols_total = batch // g, feat * g
        # else: fall back to masked stores (output is tiny in that regime anyway)

    ct = _choose_cols(cols_total, itemsize, sublane)
    bt = _choose_rows(rows_total, ct, itemsize, sublane)

    grid = (pl.cdiv(rows_total, bt), pl.cdiv(cols_total, ct))

    out_flat = pl.pallas_call(
        _constant_input_kernel,
        out_shape=jax.ShapeDtypeStruct((rows_total, cols_total), dtype),
        grid=grid,
        in_specs=[
            # Tiny constant block; identical block index for every grid row step.
            pl.BlockSpec((1, ct), lambda i, j: (0, j)),
        ],
        out_specs=pl.BlockSpec((bt, ct), lambda i, j: (i, j)),
        compiler_params=pltpu.CompilerParams(
            dimension_semantics=("parallel", "parallel"),
            vmem_limit_bytes=_VMEM_LIMIT_BYTES,
        ),
        cost_estimate=pl.CostEstimate(
            flops=0,
            transcendentals=0,
            bytes_accessed=batch * feat * itemsize + feat * itemsize,
        ),
    )(const_flat)

    # Free reshape back to NCHW for a contiguous row-major array (folding the
    # batch into the lane axis preserves row-major element order).
    return out_flat.reshape(batch, C, H, W)


class ConstantInput:
    """JAX/Pallas port of the PyTorch ConstantInput module."""

    def __init__(self, channel: int, size: int = 4, key=None):
        if key is None:
            key = jax.random.PRNGKey(0)
        # Deterministic init mirroring torch.randn(1, channel, size, size).
        self.input = jax.random.normal(key, (1, channel, size, size), jnp.float32)

    def __call__(self, x: jax.Array) -> jax.Array:
        batch = x.shape[0]
        return constant_input_forward(self.input, batch)


if __name__ == "__main__":
    key = jax.random.PRNGKey(0)
    k_param, k_x = jax.random.split(key)

    channel, size = 4, 4
    batch = 2

    module = ConstantInput(channel, size=size, key=k_param)

    # "input" tensor whose values are ignored; only its batch dim matters.
    x = jax.random.normal(k_x, (batch, channel, 16, 16), jnp.float32)

    out = module(x)
    out = jax.block_until_ready(out)

    # Reference check against plain-JAX broadcast (== torch .repeat here).
    ref = jnp.broadcast_to(module.input, (batch, channel, size, size))
    assert out.shape == (batch, channel, size, size), out.shape
    assert jnp.array_equal(out, ref), "mismatch vs reference broadcast"

    print("KERNEL_OK")
</pallas_src>

<mosaic_0001>
module attributes {stable_mosaic.version = 11 : i64} {
  func.func @_constant_input_kernel(%arg0: i32, %arg1: i32, %arg2: memref<1x128xf32, #tpu.memory_space<vmem>>, %arg3: memref<1x128xf32, #tpu.memory_space<vmem>>) attributes {dimension_semantics = [#tpu.dimension_semantics<parallel>, #tpu.dimension_semantics<parallel>], iteration_bounds = array<i64: 1, 1>, scalar_prefetch = 0 : i64, scratch_operands = 0 : i64, tpu.core_type = #tpu.core_type<tc>, window_params = [{transform_indices = @transform_0, window_bounds = array<i64: 1, 128>}, {transform_indices = @transform_1, window_bounds = array<i64: 1, 128>}]} {
    %c0 = arith.constant 0 : index
    %c0_0 = arith.constant 0 : index
    %0 = vector.load %arg2[%c0, %c0_0] : memref<1x128xf32, #tpu.memory_space<vmem>>, vector<1x128xf32>
    %c0_1 = arith.constant 0 : index
    %c0_2 = arith.constant 0 : index
    %1 = vector.load %arg3[%c0_1, %c0_2] : memref<1x128xf32, #tpu.memory_space<vmem>>, vector<1x128xf32>
    tpu.vector_store %arg3[%c0_1, %c0_2], %0 {strides = array<i32>} : memref<1x128xf32, #tpu.memory_space<vmem>>, vector<1x128xf32>,
    return
  }
  func.func @transform_0(%arg0: i32, %arg1: i32) -> (i32, i32) {
    %c0_i32 = arith.constant 0 : i32
    %c0_i32_0 = arith.constant 0 : i32
    return %c0_i32, %arg1 : i32, i32
  }
  func.func @transform_1(%arg0: i32, %arg1: i32) -> (i32, i32) {
    %c0_i32 = arith.constant 0 : i32
    return %arg0, %arg1 : i32, i32
  }
}

</mosaic_0001>

<bundles_post_ra>
// kernel: tpu_custom_call.1
= control target key start
LH: loop header
LB: loop body
LE: loop exit
PB: predicated region body
PF: predicated region fallthrough
CT: control target
= control target key end

     0   :  { %6 = vsyncpa [#allocation3], 0  ;;  %s124_s0 = inlined_call_operand.hbm [shape: f32[1,128], index: 0, kind: input, shape index: {}]   ;;  %s125_s1 = inlined_call_operand.hbm [shape: f32[1,128], index: 1, kind: output, shape index: {}]  }
   0x1   :  { %7 = vsyncpa [#allocation4], 0  ;;  %s88_s6 = smov [#allocation2]   ;;  %s40_s10 = scalar_lea.hbm %s124_s0, 16 }
   0x2   :  { %s14_s7 = sshll.u32 %s88_s6, 4  ;;  %p41_p0 = scmp.ne.s32.totalorder %s124_s0, %s40_s10  ;;  %s15_s7 = int_to_ptr.vmem [resolvable:$true] %s14_s7 }
   0x3   :  { %p44_p1 = scmp.lt.u32.totalorder %s40_s10, %s124_s0 }
   0x5   :  { %p46_p2 = pnand %p44_p1, %p41_p0 }
   0x7   :  { %49 = shalt.err (!%p46_p2)
}
   0x8   :  { %s50_s15 = scalar_lea.vmem %s15_s7, 16  ;;  %s54_s16 = scalar_lea.vmem %s15_s7, 32 }
   0x9   :  { %p51_p3 = scmp.ne.s32.totalorder %s15_s7, %s50_s15  ;;  %p55_p4 = scmp.lt.s32.totalorder %s15_s7, %s15_s7 }
   0xa   :  { %p56_p5 = scmp.lt.s32.totalorder %s54_s16, %s50_s15 }
   0xc   :  { %p57_p6 = por %p56_p5, %p55_p4 }
   0xe   :  { %p58_p7 = pnand %p57_p6, %p51_p3 }
  0x10   :  { %61 = shalt.err (!%p58_p7)
}
  0x11   :  { %17 = dma.hbm_to_vmem [thread:$0]  %s124_s0, 16, %s15_s7, [#allocation3]  }
  0x12   :  { %84 = dma.done.wait [#allocation3], 16  }
  0x13   :  { %85 = vsyncadd [#allocation3], 4294967280  ;;  %s89_s19 = smov [#allocation5]   ;;  %v21_v0 = vld [vmem:[#allocation2] sm:$0x1] }
  0x14   :  { %s29_s20 = sshll.u32 %s89_s19, 4  ;;  %22 = vst [vmem:[#allocation5] sm:$0x1] %v21_v0  ;;  %s30_s20 = int_to_ptr.vmem [resolvable:$true] %s29_s20 }
  0x15   :  { %s62_s21 = scalar_lea.vmem %s30_s20, 16  ;;  %s66_s22 = scalar_lea.vmem %s30_s20, 32 }
  0x16   :  { %p63_p8 = scmp.ne.s32.totalorder %s30_s20, %s62_s21  ;;  %p67_p9 = scmp.lt.s32.totalorder %s30_s20, %s30_s20 }
  0x17   :  { %p68_p10 = scmp.lt.s32.totalorder %s66_s22, %s62_s21 }
  0x19   :  { %p69_p11 = por %p68_p10, %p67_p9 }
  0x1b   :  { %p70_p12 = pnand %p69_p11, %p63_p8 }
  0x1d   :  { %73 = shalt.err (!%p70_p12)
}
  0x1e   :  { %s74_s25 = scalar_lea.hbm %s125_s1, 16 }
  0x1f   :  { %p75_p13 = scmp.ne.s32.totalorder %s125_s1, %s74_s25  ;;  %p78_p0 = scmp.lt.u32.totalorder %s74_s25, %s125_s1 }
  0x21   :  { %p80_p1 = pnand %p78_p0, %p75_p13 }
  0x23   :  { %83 = shalt.err (!%p80_p1)
}
  0x24   :  { %32 = dma.vmem_to_hbm [thread:$0]  %s30_s20, 16, %s125_s1, [#allocation4]  }
  0x25   :  { %86 = dma.done.wait [#allocation4], 16  }
  0x26   :  { %87 = vsyncadd [#allocation4], 4294967280 }
  0x27   :  { %36 = vsyncpa [#allocation3], 1 }
  0x28   :  { %37 = vsyncpa [#allocation4], 1 }

</bundles_post_ra>
